<compile_context>
chip_gen: v7x
topology: tpu7x:2x2x1
jax: 0.10.0
libtpu: 0.0.40
codegen_flags: <defaults>
</compile_context>

<pallas_src>
import jax
import jax.numpy as jnp
from jax.experimental import pallas as pl
from jax.experimental.pallas import tpu as pltpu


def _spline_kernel(t_ref, c_ref, w_ref, o_ref):
    # t_ref: (TB, n_nodes) f32   -- row block of t
    # c_ref: (1, TB)      int32  -- group ids for this row block (lane-dense)
    # w_ref: (n_groups, n_nodes) f32 -- full embedding table, VMEM-resident
    # o_ref: (1, TB)      f32    -- per-row dot products (lane-dense)
    s = jax.lax.dot_general(
        w_ref[...], t_ref[...],
        dimension_numbers=(((1,), (1,)), ((), ())),
        preferred_element_type=jnp.float32,
    )  # (n_groups, TB): S[g, i] = dot(alphas[g], t[i])

    n_groups, tb = s.shape
    gid = jax.lax.broadcasted_iota(jnp.int32, (n_groups, tb), 0)
    mask = gid == c_ref[...]                     # (1, TB) broadcast over sublanes
    sel = jnp.where(mask, s, jnp.float32(0.0))   # keep only S[c[i], i]
    o_ref[...] = jnp.sum(sel, axis=0, keepdims=True)  # (1, TB)


def spline_regression(t, c, alphas_weight, *, block_rows=256):
    """t: (B, n_nodes) f32, c: (B,) int, alphas_weight: (n_groups, n_nodes) f32.

    Returns (B,) f32, matching torch.bmm(t[:,None,:], alphas[:,:,None]).squeeze().
    """
    B, n_nodes = t.shape
    n_groups, n_nodes_w = alphas_weight.shape
    assert n_nodes_w == n_nodes

    # Row-tile size: multiple of 128 (lane-dense output), capped for small B.
    tb = min(block_rows, ((B + 127) // 128) * 128)
    nb = pl.cdiv(B, tb)
    b_pad = nb * tb

    t_p = t.astype(jnp.float32)
    c_p = c.astype(jnp.int32)
    if b_pad != B:
        t_p = jnp.pad(t_p, ((0, b_pad - B), (0, 0)))
        c_p = jnp.pad(c_p, (0, b_pad - B))  # pad with group 0 (valid index)
    c2d = c_p.reshape(nb, tb)

    grid_spec = pltpu.PrefetchScalarGridSpec(
        num_scalar_prefetch=0,
        grid=(nb,),
        in_specs=[
            # t row block i
            pl.BlockSpec((tb, n_nodes), lambda i: (i, 0)),
            # group ids for row block i (lane-dense)
            pl.BlockSpec((1, tb), lambda i: (i, 0)),
            # full embedding table, VMEM-resident (same block every step)
            pl.BlockSpec((n_groups, n_nodes), lambda i: (0, 0)),
        ],
        out_specs=pl.BlockSpec((1, tb), lambda i: (i, 0)),
    )

    out = pl.pallas_call(
        _spline_kernel,
        out_shape=jax.ShapeDtypeStruct((nb, tb), jnp.float32),
        grid_spec=grid_spec,
        compiler_params=pltpu.CompilerParams(
            dimension_semantics=("parallel",),
        ),
    )(t_p, c2d, alphas_weight.astype(jnp.float32))

    # torch .squeeze() on (B, 1, 1) -> (B,); drop row padding.
    return out.reshape(b_pad)[:B]


if __name__ == "__main__":
    n_nodes = 128
    n_groups = 16
    B = 8

    key = jax.random.PRNGKey(0)
    k_w, k_t, k_c = jax.random.split(key, 3)

    # Deterministic "Embedding" weight init (nn.Embedding default is N(0,1)).
    alphas_weight = jax.random.normal(k_w, (n_groups, n_nodes), dtype=jnp.float32)
    t = jax.random.normal(k_t, (B, n_nodes), dtype=jnp.float32)
    c = jax.random.randint(k_c, (B,), 0, n_groups, dtype=jnp.int32)

    out = spline_regression(t, c, alphas_weight)
    jax.block_until_ready(out)

    # Reference check (plain JAX): sum(t * alphas[c], axis=-1)
    ref = jnp.sum(t * alphas_weight[c], axis=-1)
    assert out.shape == (B,)
    assert jnp.allclose(out, ref, atol=1e-5, rtol=1e-5)

    print("KERNEL_OK")
</pallas_src>

<mosaic_0001>
module attributes {stable_mosaic.version = 11 : i64} {
  func.func @_spline_kernel(%arg0: i32, %arg1: memref<128x128xf32, #tpu.memory_space<vmem>>, %arg2: memref<1x128xi32, #tpu.memory_space<vmem>>, %arg3: memref<16x128xf32, #tpu.memory_space<vmem>>, %arg4: memref<1x128xf32, #tpu.memory_space<vmem>>) attributes {dimension_semantics = [#tpu.dimension_semantics<parallel>], iteration_bounds = array<i64: 1>, scalar_prefetch = 0 : i64, scratch_operands = 0 : i64, tpu.core_type = #tpu.core_type<tc>, window_params = [{transform_indices = @transform_0, window_bounds = array<i64: 128, 128>}, {transform_indices = @transform_1, window_bounds = array<i64: 1, 128>}, {pipeline_mode = #tpu.pipeline_mode<synchronous>, transform_indices = @transform_2, window_bounds = array<i64: 16, 128>}, {transform_indices = @transform_3, window_bounds = array<i64: 1, 128>}]} {
    %c0 = arith.constant 0 : index
    %c0_0 = arith.constant 0 : index
    %0 = vector.load %arg3[%c0, %c0_0] : memref<16x128xf32, #tpu.memory_space<vmem>>, vector<16x128xf32>
    %c0_1 = arith.constant 0 : index
    %c0_2 = arith.constant 0 : index
    %1 = vector.load %arg1[%c0_1, %c0_2] : memref<128x128xf32, #tpu.memory_space<vmem>>, vector<128x128xf32>
    %cst = arith.constant dense<0.000000e+00> : vector<16x128xf32>
    %2 = tpu.matmul %0, %1, %cst {dimension_numbers = #tpu.dot_dimension_numbers<[1], [1], [0], [0], [0, 0, 1, 0], [], []>} : vector<16x128xf32>, vector<128x128xf32>, vector<16x128xf32> -> vector<16x128xf32>
    %3 = tpu.iota {dimensions = array<i32: 0>} : vector<16x128xi32>
    %c0_3 = arith.constant 0 : index
    %c0_4 = arith.constant 0 : index
    %4 = vector.load %arg2[%c0_3, %c0_4] : memref<1x128xi32, #tpu.memory_space<vmem>>, vector<1x128xi32>
    %5 = vector.broadcast %4 : vector<1x128xi32> to vector<16x128xi32>
    %6 = arith.cmpi eq, %3, %5 : vector<16x128xi32>
    %cst_5 = arith.constant 0.000000e+00 : f32
    %7 = vector.broadcast %cst_5 : f32 to vector<16x128xf32>
    %8 = arith.select %6, %2, %7 : vector<16x128xi1>, vector<16x128xf32>
    %cst_6 = arith.constant dense<0.000000e+00> : vector<128xf32>
    %9 = vector.multi_reduction <add>, %8, %cst_6 [0] : vector<16x128xf32> to vector<128xf32>
    %10 = vector.shape_cast %9 : vector<128xf32> to vector<1x128xf32>
    %c0_7 = arith.constant 0 : index
    %c0_8 = arith.constant 0 : index
    %11 = vector.load %arg4[%c0_7, %c0_8] : memref<1x128xf32, #tpu.memory_space<vmem>>, vector<1x128xf32>
    tpu.vector_store %arg4[%c0_7, %c0_8], %10 {strides = array<i32>} : memref<1x128xf32, #tpu.memory_space<vmem>>, vector<1x128xf32>,
    return
  }
  func.func @transform_0(%arg0: i32) -> (i32, i32) {
    %c0_i32 = arith.constant 0 : i32
    %c0_i32_0 = arith.constant 0 : i32
    return %arg0, %c0_i32 : i32, i32
  }
  func.func @transform_1(%arg0: i32) -> (i32, i32) {
    %c0_i32 = arith.constant 0 : i32
    %c0_i32_0 = arith.constant 0 : i32
    return %arg0, %c0_i32 : i32, i32
  }
  func.func @transform_2(%arg0: i32) -> (i32, i32) {
    %c0_i32 = arith.constant 0 : i32
    %c0_i32_0 = arith.constant 0 : i32
    %c0_i32_1 = arith.constant 0 : i32
    return %c0_i32, %c0_i32_0 : i32, i32
  }
  func.func @transform_3(%arg0: i32) -> (i32, i32) {
    %c0_i32 = arith.constant 0 : i32
    %c0_i32_0 = arith.constant 0 : i32
    return %arg0, %c0_i32 : i32, i32
  }
}

</mosaic_0001>

<bundles_post_ra>
// kernel: tpu_custom_call.1
= control target key start
LH: loop header
LB: loop body
LE: loop exit
PB: predicated region body
PF: predicated region fallthrough
CT: control target
= control target key end

     0   :  { %8 = vsyncpa [#allocation3], 0  ;;  %s399_s0 = inlined_call_operand.hbm [shape: f32[128,128], index: 0, kind: input, shape index: {}]   ;;  %s400_s1 = inlined_call_operand.vmem [shape: s32[1,128], index: 1, kind: input, shape index: {}]   ;;  %s401_s2 = inlined_call_operand.hbm [shape: f32[16,128], index: 2, kind: input, shape index: {}]   ;;  %s402_s3 = inlined_call_operand.hbm [shape: f32[1,128], index: 3, kind: output, shape index: {}]  }
   0x1   :  { %9 = vsyncpa [#allocation6], 0 }
   0x2   :  { %10 = vsyncpa [#allocation4], 0  ;;  %s335_s12 = smov [#allocation2]   ;;  %s263_s16 = scalar_lea.hbm %s399_s0, 2048 }
   0x3   :  { %s16_s13 = sshll.u32 %s335_s12, 4  ;;  %p264_p0 = scmp.ne.s32.totalorder %s399_s0, %s263_s16  ;;  %s17_s13 = int_to_ptr.vmem [resolvable:$true] %s16_s13 }
   0x4   :  { %p267_p1 = scmp.lt.u32.totalorder %s263_s16, %s399_s0 }
   0x6   :  { %p269_p2 = pnand %p267_p1, %p264_p0 }
   0x8   :  { %272 = shalt.err (!%p269_p2)
}
   0x9   :  { %s273_s21 = scalar_lea.vmem %s17_s13, 2048  ;;  %p278_p4 = scmp.lt.s32.totalorder %s17_s13, %s17_s13 }
   0xa   :  { %p274_p3 = scmp.ne.s32.totalorder %s17_s13, %s273_s21  ;;  %p279_p5 = scmp.lt.s32.totalorder %s273_s21, %s273_s21 }
   0xc   :  { %p280_p6 = por %p279_p5, %p278_p4 }
   0xe   :  { %p281_p7 = pnand %p280_p6, %p274_p3 }
  0x10   :  { %284 = shalt.err (!%p281_p7)
}
  0x11   :  { %s336_s22 = smov 128   ;;  %s337_s23 = smov 8  }
  0x12   :  { %22 = dma.hbm_to_vmem [thread:$0]  %s399_s0, 2048, %s17_s13, [#allocation3], %s336_s22, %s336_s22, %s337_s23  }
  0x13   :  { %s338_s26 = smov [#allocation5]   ;;  %s285_s30 = scalar_lea.hbm %s401_s2, 256 }
  0x14   :  { %s30_s27 = sshll.u32 %s338_s26, 4  ;;  %p286_p8 = scmp.ne.s32.totalorder %s401_s2, %s285_s30  ;;  %s31_s27 = int_to_ptr.vmem [resolvable:$true] %s30_s27 }
  0x15   :  { %p289_p9 = scmp.lt.u32.totalorder %s285_s30, %s401_s2 }
  0x17   :  { %p291_p10 = pnand %p289_p9, %p286_p8 }
  0x19   :  { %294 = shalt.err (!%p291_p10)
}
  0x1a   :  { %s295_s8 = scalar_lea.vmem %s31_s27, 256  ;;  %p300_p12 = scmp.lt.s32.totalorder %s31_s27, %s31_s27 }
  0x1b   :  { %p296_p11 = scmp.ne.s32.totalorder %s31_s27, %s295_s8  ;;  %p301_p13 = scmp.lt.s32.totalorder %s295_s8, %s295_s8 }
  0x1d   :  { %p302_p0 = por %p301_p13, %p300_p12 }
  0x1f   :  { %p303_p1 = pnand %p302_p0, %p296_p11 }
  0x21   :  { %306 = shalt.err (!%p303_p1)
}
  0x22   :  { %36 = dma.hbm_to_vmem [thread:$0]  %s401_s2, 256, %s31_s27, [#allocation6], %s336_s22, %s336_s22, %s337_s23  }
  0x23   :  { %329 = dma.done.wait [#allocation3], 2048  }
  0x24   :  { %330 = vsyncadd [#allocation3], 4294965248 }
  0x25   :  { %331 = dma.done.wait [#allocation6], 256  }
  0x26   :  { %332 = vsyncadd [#allocation6], 4294967040  ;;  %v45_v0 = vld [vmem:[#allocation2] sm:$0xff]  ;;  %v46_v1 = vld [vmem:[#allocation2 + $0x8] sm:$0xff]  ;;  %v136_v26 = vlaneseq  ;;  %s339_s11 = smov [#allocation7]  }
  0x27   :  { %v47_v2 = vld [vmem:[#allocation2 + $0x10] sm:$0xff]  ;;  %v226_v3 = vpack.c.bf16 %v46_v1, %v45_v0  ;;  %v48_v4 = vld [vmem:[#allocation2 + $0x18] sm:$0xff]  ;;  %v43_v6 = vld [vmem:[#allocation5] sm:$0xff]  ;;  %s162_s12 = sshll.u32 %s339_s11, 4  ;;  %s163_s12 = int_to_ptr.vmem [resolvable:$true] %s162_s12 }
  0x28   :  { %v230_v5 = vpack.c.bf16 %v48_v4, %v47_v2  ;;  %v49_v7 = vld [vmem:[#allocation2 + $0x20] sm:$0xff]  ;;  %v50_v8 = vld [vmem:[#allocation2 + $0x28] sm:$0xff]  ;;  %223 = vmatprep.mubr.f32.mxu0 %v43_v6  ;;  %v51_v10 = vld [vmem:[#allocation2 + $0x30] sm:$0xff]  ;;  %v137_v27 = vshrl.u32 %v136_v26, 7  ;;  %s307_s13 = scalar_lea.vmem %s163_s12, 16  ;;  %p312_p3 = scmp.lt.s32.totalorder %s163_s12, %s163_s12 }
  0x29   :  { %227 = vmatprep.subr.bf16.mxu0 %v226_v3  ;;  %v234_v9 = vpack.c.bf16 %v50_v8, %v49_v7  ;;  %v52_v11 = vld [vmem:[#allocation2 + $0x38] sm:$0xff]  ;;  %v53_v13 = vld [vmem:[#allocation2 + $0x40] sm:$0xff]  ;;  %v54_v14 = vld [vmem:[#allocation2 + $0x48] sm:$0xff]  ;;  %p308_p2 = scmp.ne.s32.totalorder %s163_s12, %s307_s13 }
  0x2a   :  { %229 = vmatpush3.bf16.xpose.msra.mxu0 %v226_v3  ;;  %v238_v12 = vpack.c.bf16 %v52_v11, %v51_v10  ;;  %v242_v15 = vpack.c.bf16 %v54_v14, %v53_v13  ;;  %v55_v16 = vld [vmem:[#allocation2 + $0x50] sm:$0xff]  ;;  %v56_v17 = vld [vmem:[#allocation2 + $0x58] sm:$0xff]  ;;  %v57_v19 = vld [vmem:[#allocation2 + $0x60] sm:$0xff]  ;;  %v138_v28 = vadd.s32 8, %v137_v27 }
  0x2b   :  { %231 = vmatprep.subr.bf16.mxu0 %v230_v5  ;;  %v246_v18 = vpack.c.bf16 %v56_v17, %v55_v16  ;;  %v58_v20 = vld [vmem:[#allocation2 + $0x68] sm:$0xff]  ;;  %v59_v22 = vld [vmem:[#allocation2 + $0x70] sm:$0xff]  ;;  %v60_v23 = vld [vmem:[#allocation2 + $0x78] sm:$0xff] }
  0x2c   :  { %v250_v21 = vpack.c.bf16 %v58_v20, %v57_v19  ;;  %v254_v24 = vpack.c.bf16 %v60_v23, %v59_v22  ;;  %v44_v25 = vld [vmem:[#allocation5 + $0x8] sm:$0xff]  ;;  %v172_v29 = vld [vmem:[%s400_s1] ss:$0 sm:$0xff]  ;;  %s311_s1 = scalar_lea.vmem %s163_s12, 32 }
  0x2d   :  { %vm145_vm0 = vcmp.eq.s32.totalorder %v138_v28, %v172_v29  ;;  %vm144_vm1 = vcmp.eq.s32.totalorder %v137_v27, %v172_v29  ;;  %p313_p4 = scmp.lt.s32.totalorder %s311_s1, %s307_s13 }
  0x2f   :  { %p314_p5 = por %p313_p4, %p312_p3 }
  0x31   :  { %p315_p6 = pnand %p314_p5, %p308_p2 }
  0x32   :  { %233 = vmatpush3.bf16.xpose.msra.mxu0 %v230_v5 }
  0x33   :  { %235 = vmatprep.subr.bf16.mxu0 %v234_v9 }
  0x3a   :  { %237 = vmatpush3.bf16.xpose.msra.mxu0 %v234_v9 }
  0x3b   :  { %239 = vmatprep.subr.bf16.mxu0 %v238_v12 }
  0x42   :  { %241 = vmatpush3.bf16.xpose.msra.mxu0 %v238_v12 }
  0x43   :  { %243 = vmatprep.subr.bf16.mxu0 %v242_v15 }
  0x4a   :  { %245 = vmatpush3.bf16.xpose.msra.mxu0 %v242_v15 }
  0x4b   :  { %247 = vmatprep.subr.bf16.mxu0 %v246_v18 }
  0x52   :  { %249 = vmatpush3.bf16.xpose.msra.mxu0 %v246_v18 }
  0x53   :  { %251 = vmatprep.subr.bf16.mxu0 %v250_v21 }
  0x5a   :  { %253 = vmatpush3.bf16.xpose.msra.mxu0 %v250_v21 }
  0x5b   :  { %255 = vmatprep.subr.bf16.mxu0 %v254_v24 }
  0x62   :  { %257 = vmatpush3.bf16.xpose.msra.mxu0 %v254_v24 }
  0x69   :  { %224 = vmatmul.mubr.f32.vlgmr.msra.gmra.mrb[0].mxu0 %v44_v25 }
 0x13c   :  { %v225_v30 = vpop.f32.mrb[0].mxu0 }
 0x13d   :  { %v147_v31 = vsel %vm145_vm0, %v225_v30, 0.0  ;;  %v127_v32 = vpop.f32.mrb[1].mxu0 }
 0x13e   :  { %v146_v33 = vsel %vm144_vm1, %v127_v32, 0.0 }
 0x13f   :  { %v148_v34 = vadd.f32 %v147_v31, %v146_v33 }
 0x141   :  { %v149_v35 = vrot.slane %v148_v34, 4 }
 0x143   :  { %v150_v36 = vadd.f32 %v149_v35, %v148_v34 }
 0x145   :  { %v151_v37 = vrot.slane %v150_v36, 2 }
 0x147   :  { %v152_v38 = vadd.f32 %v151_v37, %v150_v36 }
 0x149   :  { %v153_v39 = vrot.slane %v152_v38, 1 }
 0x14b   :  { %v154_v40 = vadd.f32 %v153_v39, %v152_v38 }
 0x14d   :  { %155 = vst [vmem:[#allocation7] sm:$0x1] %v154_v40 }
 0x14e   :  { %318 = shalt.err (!%p315_p6)
}
 0x14f   :  { %s319_s16 = scalar_lea.hbm %s402_s3, 16 }
 0x150   :  { %p320_p7 = scmp.ne.s32.totalorder %s402_s3, %s319_s16  ;;  %p323_p8 = scmp.lt.u32.totalorder %s319_s16, %s402_s3 }
 0x152   :  { %p325_p9 = pnand %p323_p8, %p320_p7 }
 0x154   :  { %328 = shalt.err (!%p325_p9)
}
 0x155   :  { %165 = dma.vmem_to_hbm [thread:$0]  %s163_s12, 16, %s402_s3, [#allocation4]  }
 0x156   :  { %333 = dma.done.wait [#allocation4], 16  }
 0x157   :  { %334 = vsyncadd [#allocation4], 4294967280 }
 0x158   :  { %169 = vsyncpa [#allocation3], 1 }
 0x159   :  { %170 = vsyncpa [#allocation6], 1 }
 0x15a   :  { %171 = vsyncpa [#allocation4], 1 }

</bundles_post_ra>
